<compile_context>
chip_gen: v6e
topology: v6e:2x2x1
jax: 0.10.0
libtpu: 0.0.40
codegen_flags: <defaults>
</compile_context>

<pallas_src>
import functools
import math

import jax
import jax.numpy as jnp
from jax.experimental import pallas as pl
from jax.experimental.pallas import tpu as pltpu


_LANE = 128
_BLOCK_ELEMS = (2 * 1024 * 1024) // 4        # ~2 MiB of f32 per activation block
_VMEM_LIMIT_BYTES = 48 * 1024 * 1024         # < v7x 64 MiB physical, > v5e 16 MiB default


# ----------------------------------------------------------------------------
# Small integer helpers (all static / trace-time)
# ----------------------------------------------------------------------------
def _cdiv(a, b):
    return -(-a // b)


def _round_up(x, m):
    return _cdiv(x, m) * m


def _sublane_multiple(dtype):
    # min sublane tile: f32 -> 8, bf16/f16 -> 16, int8/fp8 -> 32
    return {4: 8, 2: 16, 1: 32}.get(jnp.dtype(dtype).itemsize, 8)


def _row_tile(m, width, dtype):
    """Sublane tile for an (m, width) layout: ~2 MiB blocks, >=2 grid steps."""
    sub = _sublane_multiple(dtype)
    budget = max(sub, (_BLOCK_ELEMS // max(width, 1)) // sub * sub)
    if m > budget:
        return budget
    if m > sub:                                # split so the 2nd TC gets work (v7x)
        return min(m, _round_up(_cdiv(m, 2), sub))
    return m                                   # tiny: full dim (allowed)


def _cf_tiles(n, c, hw):
    """(batch tile, spatial tile) for a (n, c, hw) channels_first layout."""
    slab = max(c, 1) * hw                      # elements of one (1, C, HW) slab
    if slab >= _BLOCK_ELEMS:
        ts = max(_LANE, (_BLOCK_ELEMS // max(c, 1)) // _LANE * _LANE)
        ts = hw if ts >= hw else ts            # full dim or a multiple of 128
        tb = 1
    else:
        ts = hw
        tb = min(n, max(1, _BLOCK_ELEMS // slab))
    if _cdiv(n, tb) * _cdiv(hw, ts) < 2:       # guarantee >=2 grid steps (v7x)
        if n >= 2:
            tb = _cdiv(n, 2)
        elif hw >= 2 * _LANE:
            ts = _round_up(_cdiv(hw, 2), _LANE)
    return tb, ts


# ----------------------------------------------------------------------------
# Kernels
# ----------------------------------------------------------------------------
def _ln_lane_kernel(x_ref, w_ref, b_ref, o_ref, *, eps):
    """channels_last, lane-dense C: x_ref (TM, C), normalize over the lane axis."""
    x = x_ref[...].astype(jnp.float32)
    mu = jnp.mean(x, axis=-1, keepdims=True)
    d = x - mu
    var = jnp.mean(d * d, axis=-1, keepdims=True)
    y = d * jax.lax.rsqrt(var + eps)           # rsqrt -> EUP slot
    o_ref[...] = (y * w_ref[...] + b_ref[...]).astype(o_ref.dtype)


def _group_mean(x, lane, c):
    """Mean over aligned lane-groups of size c (c a power of two, c | 128).

    Butterfly of XLU lane rotations: after log2(c) steps every lane holds its
    group sum (exact pairwise f32 summation).  Group boundaries are multiples
    of c, so the wrap-around lanes of the rotation are never selected.
    """
    gc = x.shape[-1]
    s = 1
    while s < c:
        plus = pltpu.roll(x, shift=gc - s, axis=1)   # lane i <- lane i + s
        minus = pltpu.roll(x, shift=s, axis=1)       # lane i <- lane i - s
        x = x + jnp.where((lane & s) == 0, plus, minus)
        s *= 2
    return x * (1.0 / c)


def _ln_packed_kernel(x_ref, w_ref, b_ref, o_ref, *, eps, c):
    """channels_last with C < 128: G = 128 // C rows folded onto the lane axis.

    x_ref: (TM, 128) where each row holds G independent C-channel groups, so
    every vreg lane, VMEM byte and store stays useful even for C = 4.
    """
    x = x_ref[...].astype(jnp.float32)
    lane = jax.lax.broadcasted_iota(jnp.int32, (1, x.shape[-1]), 1)
    mu = _group_mean(x, lane, c)
    d = x - mu
    var = _group_mean(d * d, lane, c)
    y = d * jax.lax.rsqrt(var + eps)
    o_ref[...] = (y * w_ref[...] + b_ref[...]).astype(o_ref.dtype)


def _ln_channels_first_kernel(x_ref, w_ref, b_ref, o_ref, *, eps):
    """channels_first in native NCHW layout: x_ref (TB, C, TS), reduce over C."""
    x = x_ref[...].astype(jnp.float32)
    mu = jnp.mean(x, axis=1, keepdims=True)
    d = x - mu
    var = jnp.mean(d * d, axis=1, keepdims=True)
    y = d * jax.lax.rsqrt(var + eps)
    o_ref[...] = (y * w_ref[...] + b_ref[...]).astype(o_ref.dtype)


# ----------------------------------------------------------------------------
# Public wrapper (mirrors the PyTorch module's forward)
# ----------------------------------------------------------------------------
def layer_norm(x, weight=None, bias=None, *, eps=1e-6,
               data_format="channels_first"):
    """Forward of the RevColV1 LayerNorm.  weight/bias (C,) or None (no affine)."""
    if data_format not in ("channels_last", "channels_first"):
        raise NotImplementedError(data_format)

    out_dtype = x.dtype
    eps = float(eps)
    itemsize = jnp.dtype(x.dtype).itemsize
    params = pltpu.CompilerParams(vmem_limit_bytes=_VMEM_LIMIT_BYTES)

    if data_format == "channels_last":
        c = x.shape[-1]
        m = math.prod(x.shape[:-1])
        w = (jnp.ones((c,), jnp.float32) if weight is None
             else jnp.asarray(weight, jnp.float32))
        b = (jnp.zeros((c,), jnp.float32) if bias is None
             else jnp.asarray(bias, jnp.float32))
        x2 = x.reshape(m, c)
        cost = pl.CostEstimate(flops=10 * m * c, transcendentals=m,
                               bytes_accessed=2 * m * c * itemsize)

        if c < _LANE and _LANE % c == 0:
            # ---- lane-dense repack: fold G rows onto the 128-lane axis ------
            g = _LANE // c
            m_groups = _cdiv(m, g)
            m_pad = m_groups * g
            if m_pad != m:
                x2 = jnp.pad(x2, ((0, m_pad - m), (0, 0)))
            xp = x2.reshape(m_groups, g * c)          # metadata-only reshape
            wp = jnp.tile(w, g).reshape(1, g * c)
            bp = jnp.tile(b, g).reshape(1, g * c)
            tm = _row_tile(m_groups, g * c, x.dtype)
            out = pl.pallas_call(
                functools.partial(_ln_packed_kernel, eps=eps, c=c),
                grid=(_cdiv(m_groups, tm),),
                in_specs=[
                    pl.BlockSpec((tm, g * c), lambda i: (i, 0)),
                    pl.BlockSpec((1, g * c), lambda i: (0, 0)),
                    pl.BlockSpec((1, g * c), lambda i: (0, 0)),
                ],
                out_specs=pl.BlockSpec((tm, g * c), lambda i: (i, 0)),
                out_shape=jax.ShapeDtypeStruct((m_groups, g * c), out_dtype),
                compiler_params=pltpu.CompilerParams(
                    dimension_semantics=("parallel",),
                    vmem_limit_bytes=_VMEM_LIMIT_BYTES),
                cost_estimate=cost,
            )(xp, wp, bp)
            out = out.reshape(m_pad, c)
            if m_pad != m:
                out = out[:m]
            return out.reshape(x.shape)

        # ---- C already lane-dense (multiple of 128) or an awkward width -----
        tm = _row_tile(m, c, x.dtype)
        out = pl.pallas_call(
            functools.partial(_ln_lane_kernel, eps=eps),
            grid=(_cdiv(m, tm),),
            in_specs=[
                pl.BlockSpec((tm, c), lambda i: (i, 0)),
                pl.BlockSpec((1, c), lambda i: (0, 0)),
                pl.BlockSpec((1, c), lambda i: (0, 0)),
            ],
            out_specs=pl.BlockSpec((tm, c), lambda i: (i, 0)),
            out_shape=jax.ShapeDtypeStruct((m, c), out_dtype),
            compiler_params=pltpu.CompilerParams(
                dimension_semantics=("parallel",),
                vmem_limit_bytes=_VMEM_LIMIT_BYTES),
            cost_estimate=cost,
        )(x2, w.reshape(1, c), b.reshape(1, c))
        return out.reshape(x.shape)

    # ---- channels_first: (N, C, *spatial), normalized over dim 1, native NCHW
    n, c = x.shape[0], x.shape[1]
    hw = math.prod(x.shape[2:])
    w = (jnp.ones((c,), jnp.float32) if weight is None
         else jnp.asarray(weight, jnp.float32))
    b = (jnp.zeros((c,), jnp.float32) if bias is None
         else jnp.asarray(bias, jnp.float32))
    x3 = x.reshape(n, c, hw)
    tb, ts = _cf_tiles(n, c, hw)
    out = pl.pallas_call(
        functools.partial(_ln_channels_first_kernel, eps=eps),
        grid=(_cdiv(n, tb), _cdiv(hw, ts)),
        in_specs=[
            pl.BlockSpec((tb, c, ts), lambda i, j: (i, 0, j)),
            pl.BlockSpec((1, c, 1), lambda i, j: (0, 0, 0)),
            pl.BlockSpec((1, c, 1), lambda i, j: (0, 0, 0)),
        ],
        out_specs=pl.BlockSpec((tb, c, ts), lambda i, j: (i, 0, j)),
        out_shape=jax.ShapeDtypeStruct((n, c, hw), out_dtype),
        compiler_params=pltpu.CompilerParams(
            dimension_semantics=("parallel", "parallel"),
            vmem_limit_bytes=_VMEM_LIMIT_BYTES),
        cost_estimate=pl.CostEstimate(flops=10 * n * c * hw,
                                      transcendentals=n * hw,
                                      bytes_accessed=2 * n * c * hw * itemsize),
    )(x3, w.reshape(1, c, 1), b.reshape(1, c, 1))
    return out.reshape(x.shape)


# ----------------------------------------------------------------------------
# Pure-JAX references (match the PyTorch module exactly)
# ----------------------------------------------------------------------------
def _ref_channels_first(x, w, b, eps):
    u = jnp.mean(x, axis=1, keepdims=True)
    s = jnp.mean((x - u) ** 2, axis=1, keepdims=True)
    y = (x - u) / jnp.sqrt(s + eps)
    shape = (1, -1) + (1,) * (x.ndim - 2)
    return w.reshape(shape) * y + b.reshape(shape)


def _ref_channels_last(x, w, b, eps):
    u = jnp.mean(x, axis=-1, keepdims=True)
    s = jnp.mean((x - u) ** 2, axis=-1, keepdims=True)
    y = (x - u) / jnp.sqrt(s + eps)
    return y * w + b


if __name__ == "__main__":
    key = jax.random.PRNGKey(0)
    keys = jax.random.split(key, 8)
    eps = 1e-6

    # --- small shapes matching the module's typical use ----------------------
    N, C, H, W = 2, 4, 16, 16
    weight = jax.random.normal(keys[0], (C,), jnp.float32)
    bias = jax.random.normal(keys[1], (C,), jnp.float32)

    # channels_first: (N, C, H, W)
    x_cf = jax.random.normal(keys[2], (N, C, H, W), jnp.float32)
    ln_cf = jax.jit(functools.partial(layer_norm, eps=eps,
                                      data_format="channels_first"))
    out_cf = ln_cf(x_cf, weight, bias)
    jax.block_until_ready(out_cf)
    assert out_cf.shape == x_cf.shape
    assert jnp.allclose(out_cf, _ref_channels_first(x_cf, weight, bias, eps),
                        atol=1e-5, rtol=1e-5)

    # channels_last: (N, H, W, C) -> lane-dense packed path (C=4, G=32)
    x_cl = jax.random.normal(keys[3], (N, H, W, C), jnp.float32)
    ln_cl = jax.jit(functools.partial(layer_norm, eps=eps,
                                      data_format="channels_last"))
    out_cl = ln_cl(x_cl, weight, bias)
    jax.block_until_ready(out_cl)
    assert out_cl.shape == x_cl.shape
    assert jnp.allclose(out_cl, _ref_channels_last(x_cl, weight, bias, eps),
                        atol=1e-5, rtol=1e-5)

    # elementwise_affine=False (channels_first)
    out_na = layer_norm(x_cf, eps=eps, data_format="channels_first")
    ref_na = _ref_channels_first(x_cf, jnp.ones((C,), jnp.float32),
                                 jnp.zeros((C,), jnp.float32), eps)
    assert jnp.allclose(out_na, ref_na, atol=1e-5, rtol=1e-5)

    # --- larger shapes: multi-block grids, batch tiling, ragged edges --------
    C2 = 8
    w2 = jax.random.normal(keys[4], (C2,), jnp.float32)
    b2 = jax.random.normal(keys[5], (C2,), jnp.float32)

    x_big_cf = jax.random.normal(keys[6], (2, C2, 72, 72), jnp.float32)
    out_big_cf = layer_norm(x_big_cf, w2, b2, eps=eps, data_format="channels_first")
    jax.block_until_ready(out_big_cf)
    assert jnp.allclose(out_big_cf, _ref_channels_first(x_big_cf, w2, b2, eps),
                        atol=1e-5, rtol=1e-5)

    x_big_cl = jax.random.normal(keys[7], (2, 32, 32, C2), jnp.float32)
    out_big_cl = layer_norm(x_big_cl, w2, b2, eps=eps, data_format="channels_last")
    jax.block_until_ready(out_big_cl)
    assert jnp.allclose(out_big_cl, _ref_channels_last(x_big_cl, w2, b2, eps),
                        atol=1e-5, rtol=1e-5)

    # lane-dense C (multiple of 128) -> plain lane kernel
    C3 = 256
    w3 = jax.random.normal(keys[0], (C3,), jnp.float32)
    b3 = jax.random.normal(keys[1], (C3,), jnp.float32)
    x_cl3 = jax.random.normal(keys[2], (2, 8, 8, C3), jnp.float32)
    out_cl3 = layer_norm(x_cl3, w3, b3, eps=eps, data_format="channels_last")
    jax.block_until_ready(out_cl3)
    assert jnp.allclose(out_cl3, _ref_channels_last(x_cl3, w3, b3, eps),
                        atol=1e-5, rtol=1e-5)

    # packed path where the row count is not divisible by G (exercises padding)
    x_cl4 = jax.random.normal(keys[3], (3, 5, 5, C), jnp.float32)   # M=75, G=32
    out_cl4 = layer_norm(x_cl4, weight, bias, eps=eps, data_format="channels_last")
    jax.block_until_ready(out_cl4)
    assert jnp.allclose(out_cl4, _ref_channels_last(x_cl4, weight, bias, eps),
                        atol=1e-5, rtol=1e-5)

    # bf16 input: sublane tile rounded to 16, f32 compute in-kernel, bf16 store
    x_bf = jax.random.normal(keys[4], (N, H, W, C), jnp.float32).astype(jnp.bfloat16)
    out_bf = layer_norm(x_bf, weight, bias, eps=eps, data_format="channels_last")
    jax.block_until_ready(out_bf)
    assert out_bf.dtype == jnp.bfloat16
    ref_bf = _ref_channels_last(x_bf.astype(jnp.float32), weight, bias, eps)
    assert jnp.allclose(out_bf.astype(jnp.float32), ref_bf, atol=5e-2, rtol=5e-2)

    print("KERNEL_OK")
</pallas_src>

<mosaic_0001>
module attributes {stable_mosaic.version = 11 : i64} {
  func.func @_ln_channels_first_kernel(%arg0: i32, %arg1: i32, %arg2: memref<1x4x256xf32, #tpu.memory_space<vmem>>, %arg3: memref<1x4x1xf32, #tpu.memory_space<vmem>>, %arg4: memref<1x4x1xf32, #tpu.memory_space<vmem>>, %arg5: memref<1x4x256xf32, #tpu.memory_space<vmem>>) attributes {dimension_semantics = [#tpu.dimension_semantics<parallel>, #tpu.dimension_semantics<parallel>], iteration_bounds = array<i64: 2, 1>, scalar_prefetch = 0 : i64, scratch_operands = 0 : i64, tpu.core_type = #tpu.core_type<tc>, window_params = [{transform_indices = @transform_0, window_bounds = array<i64: 1, 4, 256>}, {pipeline_mode = #tpu.pipeline_mode<synchronous>, transform_indices = @transform_1, window_bounds = array<i64: 1, 4, 1>}, {pipeline_mode = #tpu.pipeline_mode<synchronous>, transform_indices = @transform_2, window_bounds = array<i64: 1, 4, 1>}, {transform_indices = @transform_3, window_bounds = array<i64: 1, 4, 256>}]} {
    %c0 = arith.constant 0 : index
    %c0_0 = arith.constant 0 : index
    %c0_1 = arith.constant 0 : index
    %0 = vector.load %arg2[%c0, %c0_0, %c0_1] : memref<1x4x256xf32, #tpu.memory_space<vmem>>, vector<1x4x256xf32>
    %cst = arith.constant dense<0.000000e+00> : vector<1x256xf32>
    %1 = vector.multi_reduction <add>, %0, %cst [1] : vector<1x4x256xf32> to vector<1x256xf32>
    %2 = vector.shape_cast %1 : vector<1x256xf32> to vector<1x1x256xf32>
    %cst_2 = arith.constant 4.000000e+00 : f32
    %3 = vector.broadcast %cst_2 : f32 to vector<1x1x256xf32>
    %4 = arith.divf %2, %3 : vector<1x1x256xf32>
    %5 = vector.broadcast %4 : vector<1x1x256xf32> to vector<1x4x256xf32>
    %6 = arith.subf %0, %5 : vector<1x4x256xf32>
    %7 = arith.mulf %6, %6 : vector<1x4x256xf32>
    %cst_3 = arith.constant dense<0.000000e+00> : vector<1x256xf32>
    %8 = vector.multi_reduction <add>, %7, %cst_3 [1] : vector<1x4x256xf32> to vector<1x256xf32>
    %9 = vector.shape_cast %8 : vector<1x256xf32> to vector<1x1x256xf32>
    %cst_4 = arith.constant 4.000000e+00 : f32
    %10 = vector.broadcast %cst_4 : f32 to vector<1x1x256xf32>
    %11 = arith.divf %9, %10 : vector<1x1x256xf32>
    %cst_5 = arith.constant 9.99999997E-7 : f32
    %12 = vector.broadcast %cst_5 : f32 to vector<1x1x256xf32>
    %13 = arith.addf %11, %12 : vector<1x1x256xf32>
    %14 = math.rsqrt %13 : vector<1x1x256xf32>
    %15 = vector.broadcast %14 : vector<1x1x256xf32> to vector<1x4x256xf32>
    %16 = arith.mulf %6, %15 : vector<1x4x256xf32>
    %c0_6 = arith.constant 0 : index
    %c0_7 = arith.constant 0 : index
    %c0_8 = arith.constant 0 : index
    %17 = vector.load %arg3[%c0_6, %c0_7, %c0_8] : memref<1x4x1xf32, #tpu.memory_space<vmem>>, vector<1x4x1xf32>
    %18 = vector.broadcast %17 : vector<1x4x1xf32> to vector<1x4x256xf32>
    %19 = arith.mulf %16, %18 : vector<1x4x256xf32>
    %c0_9 = arith.constant 0 : index
    %c0_10 = arith.constant 0 : index
    %c0_11 = arith.constant 0 : index
    %20 = vector.load %arg4[%c0_9, %c0_10, %c0_11] : memref<1x4x1xf32, #tpu.memory_space<vmem>>, vector<1x4x1xf32>
    %21 = vector.broadcast %20 : vector<1x4x1xf32> to vector<1x4x256xf32>
    %22 = arith.addf %19, %21 : vector<1x4x256xf32>
    %c0_12 = arith.constant 0 : index
    %c0_13 = arith.constant 0 : index
    %c0_14 = arith.constant 0 : index
    %23 = vector.load %arg5[%c0_12, %c0_13, %c0_14] : memref<1x4x256xf32, #tpu.memory_space<vmem>>, vector<1x4x256xf32>
    tpu.vector_store %arg5[%c0_12, %c0_13, %c0_14], %22 {strides = array<i32>} : memref<1x4x256xf32, #tpu.memory_space<vmem>>, vector<1x4x256xf32>,
    return
  }
  func.func @transform_0(%arg0: i32, %arg1: i32) -> (i32, i32, i32) {
    %c0_i32 = arith.constant 0 : i32
    %c0_i32_0 = arith.constant 0 : i32
    return %arg0, %c0_i32, %arg1 : i32, i32, i32
  }
  func.func @transform_1(%arg0: i32, %arg1: i32) -> (i32, i32, i32) {
    %c0_i32 = arith.constant 0 : i32
    %c0_i32_0 = arith.constant 0 : i32
    %c0_i32_1 = arith.constant 0 : i32
    %c0_i32_2 = arith.constant 0 : i32
    return %c0_i32, %c0_i32_0, %c0_i32_1 : i32, i32, i32
  }
  func.func @transform_2(%arg0: i32, %arg1: i32) -> (i32, i32, i32) {
    %c0_i32 = arith.constant 0 : i32
    %c0_i32_0 = arith.constant 0 : i32
    %c0_i32_1 = arith.constant 0 : i32
    %c0_i32_2 = arith.constant 0 : i32
    return %c0_i32, %c0_i32_0, %c0_i32_1 : i32, i32, i32
  }
  func.func @transform_3(%arg0: i32, %arg1: i32) -> (i32, i32, i32) {
    %c0_i32 = arith.constant 0 : i32
    %c0_i32_0 = arith.constant 0 : i32
    return %arg0, %c0_i32, %arg1 : i32, i32, i32
  }
}

</mosaic_0001>

<bundles_post_ra>
// kernel: layer_norm.1
= control target key start
LH: loop header
LB: loop body
LE: loop exit
PB: predicated region body
PF: predicated region fallthrough
CT: control target
= control target key end

     0   :  { %s473_s12 = smov 0   ;;  %s475_s13 = smov 0   ;;  %s523_s0 = inlined_call_operand.vmem [shape: f32[2,4,256], index: 0, kind: input, shape index: {}]   ;;  %s524_s1 = inlined_call_operand.vmem [shape: f32[1,4,1], index: 1, kind: input, shape index: {}]   ;;  %s525_s2 = inlined_call_operand.vmem [shape: f32[1,4,1], index: 2, kind: input, shape index: {}]   ;;  %s526_s3 = inlined_call_operand.vmem [shape: f32[2,4,256], index: 3, kind: output, shape index: {}]  }
   0x1   :  { %s477_s14 = smov 0  }
   0x2 LB: > { %s25_s15 = sadd.s32 1, %s445_s13  ;;  %p386_p0 = scmp.ge.s32.totalorder %s449_s14, 1  ;;  %s449_s14 = sphi %s477_s14, %s13_s14   ;;  %s445_s13 = sphi %s475_s13, %s528_s13   ;;  %s441_s12 = sphi %s473_s12, %s527_s12  }
   0x3   : > { %p27_p1 = scmp.ge.s32.totalorder %s25_s15, 2  ;;  %p158_p2 = scmp.lt.s32.totalorder %s449_s14, 3 }
   0x5   : > { %s530_s15 = smov (%p27_p1, %s25_s15), 0  ;;  %p159_p3 = pnand %p386_p0, %p158_p2 }
   0x6   : > { %p191_p4 = scmp.lt.s32.totalorder (!%p159_p3), %s441_s12, 1 }
   0x7   : > { %162 = sbr.rel (%p159_p3) target bundleno = 147 (0x93), region = 32 }
   0xc   : > { %v266_v0 = vld [vmem:[%s524_s1] sm:$0xf]  ;;  %v451_v1 = vmov 0   ;;  %s532_s12 = smov (!%p191_p4, %s441_s12), 1  ;;  %vm214_vm0 = vcmask 1043456   ;;  %v274_v45 = vlaneseq }
   0xd   : > { %421 = vset.pattern.permute.xlu0 %v451_v1  ;;  %v280_v2 = vld [vmem:[%s525_s2] sm:$0xf]  ;;  %s393_s20 = sshll.u32 %s532_s12, 3  ;;  %v452_v43 = vmov 839922192  }
   0xe   : > { %269 = vperm.xlu0 %421, %v266_v0   ;;  %s198_s23 = scalar_lea.vmem %s523_s0, %s393_s20  ;;  %v272_v44 = vunpack.c.l.s4 %v452_v43  ;;  %v275_v48 = vshrl.u32 %v274_v45, 7  ;;  %s208_s26 = scalar_lea.vmem %s526_s3, %s393_s20 }
   0xf   : > { %v210_v3 = vld [vmem:[%s198_s23] sm:$0xff] }
  0x10   : > { %v212_v4 = vcombine.high %v210_v3, %v210_v3  ;;  %v215_v5 = vsel %vm214_vm0, %v210_v3, 0.0  ;;  %v273_v47 = vunpack.c.0.s8 %v272_v44 }
  0x11   : > { %v216_v7 = vrot.slane %v215_v5, 4 }
  0x12   : > { %283 = vperm.xlu0 %421, %v280_v2   ;;  %v222_v6 = vsel %vm214_vm0, %v212_v4, 0.0  ;;  %v276_v50 = vsub.s32 %v273_v47, %v275_v48 }
  0x13   : > { %v223_v8 = vrot.slane %v222_v6, 4  ;;  %v217_v9 = vadd.f32 %v216_v7, %v215_v5 }
  0x15   : > { %v224_v10 = vadd.f32 %v223_v8, %v222_v6  ;;  %v218_v11 = vrot.slane %v217_v9, 2 }
  0x17   : > { %v225_v12 = vrot.slane %v224_v10, 2  ;;  %v219_v13 = vadd.f32 %v218_v11, %v217_v9 }
  0x19   : > { %v226_v14 = vadd.f32 %v225_v12, %v224_v10  ;;  %v220_v15 = vrot.slane %v219_v13, 1 }
  0x1b   : > { %v227_v16 = vrot.slane %v226_v14, 1  ;;  %v221_v17 = vadd.f32 %v220_v15, %v219_v13 }
  0x1d   : > { %v228_v18 = vadd.f32 %v227_v16, %v226_v14  ;;  %v230_v19 = vmul.f32 0.25, %v221_v17 }
  0x1f   : > { %v231_v20 = vmul.f32 0.25, %v228_v18 }
  0x21   : > { %v234_v21 = vcombine.low %v230_v19, %v231_v20 }
  0x23   : > { %v236_v22 = vsub.f32 %v210_v3, %v234_v21 }
  0x25   : > { %v237_v23 = vmul.f32 %v236_v22, %v236_v22 }
  0x27   : > { %v239_v24 = vcombine.high %v237_v23, %v237_v23  ;;  %v241_v25 = vsel %vm214_vm0, %v237_v23, 0.0 }
  0x28   : > { %v242_v27 = vrot.slane %v241_v25, 4 }
  0x29   : > { %v248_v26 = vsel %vm214_vm0, %v239_v24, 0.0 }
  0x2a   : > { %v249_v28 = vrot.slane %v248_v26, 4  ;;  %v243_v29 = vadd.f32 %v242_v27, %v241_v25 }
  0x2c   : > { %v250_v30 = vadd.f32 %v249_v28, %v248_v26  ;;  %v244_v31 = vrot.slane %v243_v29, 2 }
  0x2e   : > { %v251_v32 = vrot.slane %v250_v30, 2  ;;  %v245_v33 = vadd.f32 %v244_v31, %v243_v29 }
  0x30   : > { %v252_v34 = vadd.f32 %v251_v32, %v250_v30  ;;  %v246_v35 = vrot.slane %v245_v33, 1 }
  0x32   : > { %v253_v36 = vrot.slane %v252_v34, 1  ;;  %v247_v37 = vadd.f32 %v246_v35, %v245_v33 }
  0x34   : > { %v254_v38 = vadd.f32 %v253_v36, %v252_v34  ;;  %v255_v39 = vmul.f32 0.25, %v247_v37 }
  0x36   : > { %v256_v40 = vmul.f32 0.25, %v254_v38  ;;  %v257_v41 = vadd.f32 1e-06, %v255_v39 }
  0x38   : > { %v258_v42 = vadd.f32 1e-06, %v256_v40  ;;  %423 = vrsqrt.f32 %v257_v41 }
  0x3a   : > { %425 = vrsqrt.f32 %v258_v42 }
  0x45   : > { %v424_v46 = vpop.eup %423 }
  0x47   : > { %v426_v49 = vpop.eup %425 }
  0x48   : > { %v263_v51 = vcombine.low %v424_v46, %v426_v49 }
  0x4a   : > { %v265_v53 = vmul.f32 %v263_v51, %v236_v22 }
  0x89   : > { %v270_v52 = vpop.permute.xlu0 %269 }
  0x8a   : > { %v277_v54 = vrot.slane %v270_v52, %v276_v50 }
  0x8c   : > { %v279_v56 = vmul.f32 %v277_v54, %v265_v53 }
  0x8d   : > { %v284_v55 = vpop.permute.xlu0 %283 }
  0x8e   : > { %v291_v57 = vrot.slane %v284_v55, %v276_v50 }
  0x90   : > { %v293_v58 = vadd.f32 %v291_v57, %v279_v56 }
  0x92   : > { %294 = vst [vmem:[%s208_s26] sm:$0xff] %v293_v58 }
  0x93 PF: > { %s13_s14 = sadd.s32 1, %s449_s14   ;;  %s527_s12 = smov %s445_s13 }
  0x94   : > { %p10_p5 = scmp.ge.s32.totalorder %s13_s14, 4   ;;  %s528_s13 = smov %s530_s15 }
  0x96   :  { %12 = sbr.rel (!%p10_p5) target bundleno = 2 (0x2), region = 62 }

</bundles_post_ra>
